<compile_context>
chip_gen: v5e
topology: v5e:2x2
jax: 0.10.0
libtpu: 0.0.40
codegen_flags: <defaults>
</compile_context>

<pallas_src>
import math

import jax
import jax.numpy as jnp
from jax.experimental import pallas as pl
from jax.experimental.pallas import tpu as pltpu

_SQRT_2_OVER_PI = math.sqrt(2.0 / math.pi)
_GELU_COEF = 0.044715


def _gelu_residual_kernel(x_ref, o_ref):
    # Load in native dtype, compute in f32, cast back on store.
    x = x_ref[...].astype(jnp.float32)
    x2 = x * x
    inner = (_SQRT_2_OVER_PI * x) * (1.0 + _GELU_COEF * x2)
    t = jnp.tanh(inner)                      # EUP slot (free-ish vs VPU)
    # x + 0.5*x*(1 + t)  ==  x * (1.5 + 0.5*t)
    o_ref[...] = (x * (1.5 + 0.5 * t)).astype(o_ref.dtype)


def gelu_residual(x):
    """x: any-shape float array (module uses NCHW). Returns x + gelu_tanh(x)."""
    orig_shape = x.shape
    dtype = x.dtype
    n = x.size

    xf = jnp.reshape(x, (-1,))

    # Widest lane dim (multiple of 128) dividing the element count -> no
    # padding pass and lane-dense stores.
    lane = None
    for w in (4096, 2048, 1024, 512, 256, 128):
        if n % w == 0:
            lane = w
            break
    pad = 0
    if lane is None:
        # Degenerate sizes only: pad the flat vector to a lane multiple.
        lane = 128
        pad = (-n) % lane
        xf = jnp.concatenate([xf, jnp.zeros((pad,), dtype=dtype)])

    rows = xf.size // lane
    x2d = jnp.reshape(xf, (rows, lane))

    itemsize = jnp.dtype(dtype).itemsize
    # Sublane multiple for the packed dtype (f32: 8, bf16/f16: 16, i8/fp8: 32).
    sub_mult = {4: 8, 2: 16, 1: 32}.get(itemsize, 8)

    # Target ~2 MiB per tile (in + out, double-buffered => ~8 MiB VMEM).
    target_rows = max(1, (2 << 20) // (lane * itemsize))
    if rows <= max(target_rows, sub_mult):
        # Block dim == full array dim is always legal.
        row_blk = rows
    else:
        row_blk = max(sub_mult, (target_rows // sub_mult) * sub_mult)

    grid = (pl.cdiv(rows, row_blk),)

    out2d = pl.pallas_call(
        _gelu_residual_kernel,
        out_shape=jax.ShapeDtypeStruct((rows, lane), dtype),
        grid_spec=pltpu.PrefetchScalarGridSpec(
            num_scalar_prefetch=0,
            grid=grid,
            in_specs=[pl.BlockSpec((row_blk, lane), lambda i: (i, 0))],
            out_specs=pl.BlockSpec((row_blk, lane), lambda i: (i, 0)),
        ),
        compiler_params=pltpu.CompilerParams(
            dimension_semantics=("parallel",),
            vmem_limit_bytes=32 << 20,
        ),
    )(x2d)

    out = jnp.reshape(out2d, (-1,))
    if pad:
        out = out[:n]
    return jnp.reshape(out, orig_shape)


if __name__ == "__main__":
    key = jax.random.PRNGKey(0)
    x = jax.random.normal(key, (2, 4, 16, 16), dtype=jnp.float32)  # NCHW

    y = gelu_residual(x)
    y = jax.block_until_ready(y)

    # Reference (plain JAX, mirrors the PyTorch forward exactly).
    c = jnp.sqrt(2.0 / jnp.pi)
    gelu_ref = 0.5 * x * (1.0 + jnp.tanh(c * (x + 0.044715 * jnp.power(x, 3))))
    y_ref = x + gelu_ref
    assert jnp.allclose(y, y_ref, atol=1e-5, rtol=1e-5), "mismatch vs reference"

    print("KERNEL_OK")
</pallas_src>

<mosaic_0001>
module attributes {stable_mosaic.version = 11 : i64} {
  func.func @_gelu_residual_kernel(%arg0: i32, %arg1: memref<1x2048xf32, #tpu.memory_space<vmem>>, %arg2: memref<1x2048xf32, #tpu.memory_space<vmem>>) attributes {dimension_semantics = [#tpu.dimension_semantics<parallel>], iteration_bounds = array<i64: 1>, scalar_prefetch = 0 : i64, scratch_operands = 0 : i64, tpu.core_type = #tpu.core_type<tc>, window_params = [{transform_indices = @transform_0, window_bounds = array<i64: 1, 2048>}, {transform_indices = @transform_1, window_bounds = array<i64: 1, 2048>}]} {
    %c0 = arith.constant 0 : index
    %c0_0 = arith.constant 0 : index
    %0 = vector.load %arg1[%c0, %c0_0] : memref<1x2048xf32, #tpu.memory_space<vmem>>, vector<1x2048xf32>
    %1 = arith.mulf %0, %0 : vector<1x2048xf32>
    %cst = arith.constant 0.797884583 : f32
    %2 = vector.broadcast %cst : f32 to vector<1x2048xf32>
    %3 = arith.mulf %2, %0 : vector<1x2048xf32>
    %cst_1 = arith.constant 4.471500e-02 : f32
    %4 = vector.broadcast %cst_1 : f32 to vector<1x2048xf32>
    %5 = arith.mulf %4, %1 : vector<1x2048xf32>
    %cst_2 = arith.constant 1.000000e+00 : f32
    %6 = vector.broadcast %cst_2 : f32 to vector<1x2048xf32>
    %7 = arith.addf %6, %5 : vector<1x2048xf32>
    %8 = arith.mulf %3, %7 : vector<1x2048xf32>
    %9 = math.tanh %8 : vector<1x2048xf32>
    %cst_3 = arith.constant 5.000000e-01 : f32
    %10 = vector.broadcast %cst_3 : f32 to vector<1x2048xf32>
    %11 = arith.mulf %10, %9 : vector<1x2048xf32>
    %cst_4 = arith.constant 1.500000e+00 : f32
    %12 = vector.broadcast %cst_4 : f32 to vector<1x2048xf32>
    %13 = arith.addf %12, %11 : vector<1x2048xf32>
    %14 = arith.mulf %0, %13 : vector<1x2048xf32>
    %c0_5 = arith.constant 0 : index
    %c0_6 = arith.constant 0 : index
    %15 = vector.load %arg2[%c0_5, %c0_6] : memref<1x2048xf32, #tpu.memory_space<vmem>>, vector<1x2048xf32>
    tpu.vector_store %arg2[%c0_5, %c0_6], %14 {strides = array<i32>} : memref<1x2048xf32, #tpu.memory_space<vmem>>, vector<1x2048xf32>,
    return
  }
  func.func @transform_0(%arg0: i32) -> (i32, i32) {
    %c0_i32 = arith.constant 0 : i32
    %c0_i32_0 = arith.constant 0 : i32
    return %arg0, %c0_i32 : i32, i32
  }
  func.func @transform_1(%arg0: i32) -> (i32, i32) {
    %c0_i32 = arith.constant 0 : i32
    %c0_i32_0 = arith.constant 0 : i32
    return %arg0, %c0_i32 : i32, i32
  }
}

</mosaic_0001>

<bundles_post_ra>
// kernel: tpu_custom_call.1
= control target key start
LH: loop header
LB: loop body
LE: loop exit
PB: predicated region body
PF: predicated region fallthrough
CT: control target
= control target key end

     0   :  { %6 = vsyncpa [#allocation3], 0  ;;  %s138_s0 = inlined_call_operand.hbm [shape: f32[1,2048], index: 0, kind: input, shape index: {}]   ;;  %s139_s1 = inlined_call_operand.hbm [shape: f32[1,2048], index: 1, kind: output, shape index: {}]  }
   0x1   :  { %7 = vsyncpa [#allocation4], 0  ;;  %s13_s8 = sshll.u32 %s138_s0, 4  ;;  %s120_s9 = smov [#allocation2]   ;;  %s14_s8 = int_to_ptr.hbm [resolvable:$true] %s13_s8 }
   0x2   :  { %s15_s10 = sshll.u32 %s120_s9, 4  ;;  %s16_s10 = int_to_ptr.vmem [resolvable:$true] %s15_s10 }
   0x3   :  { %18 = dma.hbm_to_vmem [thread:$0]  %s14_s8, 256, %s16_s10, [#allocation3]  }
   0x4   :  { %116 = dma.done.wait [#allocation3], 256  }
   0x5   :  { %117 = vsyncadd [#allocation3], 4294967040  ;;  %v23_v0 = vld [vmem:[#allocation2] sm:$0xff]  ;;  %v24_v1 = vld [vmem:[#allocation2 + $0x8] sm:$0xff]  ;;  %s121_s0 = smov [#allocation5]   ;;  %s52_s14 = sshll.u32 %s139_s1, 4  ;;  %s53_s14 = int_to_ptr.hbm [resolvable:$true] %s52_s14 }
   0x6   :  { %v25_v2 = vmul.f32 %v23_v0, %v23_v0  ;;  %v26_v3 = vmul.f32 %v24_v1, %v24_v1  ;;  %v27_v4 = vmul.f32 0.7978846, %v23_v0  ;;  %v28_v6 = vmul.f32 0.7978846, %v24_v1  ;;  %s50_s11 = sshll.u32 %s121_s0, 4  ;;  %s51_s11 = int_to_ptr.vmem [resolvable:$true] %s50_s11 }
   0x8   :  { %v29_v5 = vmul.f32 0.044715, %v25_v2  ;;  %v30_v7 = vmul.f32 0.044715, %v26_v3 }
   0xa   :  { %v31_v8 = vadd.f32 1.0, %v29_v5  ;;  %v32_v9 = vadd.f32 1.0, %v30_v7 }
   0xc   :  { %v33_v10 = vmul.f32 %v31_v8, %v27_v4  ;;  %v34_v11 = vmul.f32 %v32_v9, %v28_v6 }
   0xe   :  { %64 = vtanh.f32 %v33_v10 }
   0xf   :  { %66 = vtanh.f32 %v34_v11 }
  0x14   :  { %v65_v12 = vpop.eup %64 }
  0x15   :  { %v67_v13 = vpop.eup %66  ;;  %v37_v14 = vmul.f32 0.5, %v65_v12 }
  0x16   :  { %v38_v15 = vmul.f32 0.5, %v67_v13 }
  0x17   :  { %v39_v16 = vadd.f32 1.5, %v37_v14 }
  0x18   :  { %v40_v17 = vadd.f32 1.5, %v38_v15 }
  0x19   :  { %v41_v18 = vmul.f32 %v39_v16, %v23_v0 }
  0x1a   :  { %v42_v19 = vmul.f32 %v40_v17, %v24_v1 }
  0x1b   :  { %43 = vst [vmem:[#allocation5] sm:$0xff] %v41_v18 }
  0x1c   :  { %44 = vst [vmem:[#allocation5 + $0x8] sm:$0xff] %v42_v19 }
  0x1d   :  { %55 = dma.vmem_to_hbm [thread:$0]  %s51_s11, 256, %s53_s14, [#allocation4]  }
  0x1e   :  { %118 = dma.done.wait [#allocation4], 256  }
  0x1f   :  { %119 = vsyncadd [#allocation4], 4294967040 }
  0x20   :  { %60 = vsyncpa [#allocation3], 1 }
  0x21   :  { %61 = vsyncpa [#allocation4], 1 }

</bundles_post_ra>
